<compile_context>
chip_gen: v7x
topology: tpu7x:2x2x1
jax: 0.10.0
libtpu: 0.0.40
codegen_flags: <defaults>
</compile_context>

<pallas_src>
import functools

import jax
import jax.numpy as jnp
from jax.experimental import pallas as pl
from jax.experimental.pallas import tpu as pltpu


_LANE = 128


def _vmem_capacity_bytes():
    """Physical VMEM of the local chip (conservative fallback: v7x's 64 MiB)."""
    try:
        info = pltpu.get_tpu_info()
        cap = getattr(info, "vmem_capacity_bytes", None)
        if cap:
            return int(cap)
    except Exception:
        pass
    return 64 << 20


def _block_bytes_cap():
    # ~1/8 of physical VMEM per block: 8 MiB on v7x, 16 MiB on v5e/v6e.
    # Double-buffered in+out plus in-kernel temporaries then stays well inside
    # every generation's budget while sitting near the HBM roofline.
    cap = _vmem_capacity_bytes() // 8
    return int(min(max(cap, 4 << 20), 24 << 20))


def _pick_batch_block(batch, per_batch_bytes, cap):
    """Largest divisor of `batch` whose slab fits the cap, while keeping >=2
    grid steps whenever batch >= 2 (both v7x TensorCores get work) and >=4
    steps when batch allows (pipeline overlap).  Per-step overhead (~0.35 us)
    is tiny next to the ~2x bandwidth win of using both cores."""
    bb_cap = max(1, cap // max(per_batch_bytes, 1))
    if batch >= 4:
        bb_cap = min(bb_cap, batch // 4)
    elif batch >= 2:
        bb_cap = min(bb_cap, batch // 2)
    bb_cap = max(bb_cap, 1)
    for bb in range(min(batch, bb_cap), 0, -1):
        if batch % bb == 0:
            return bb
    return 1


# ----------------------------------------------------------------------------
# Single-pass kernel: whole (Bb, C, HW) slab per grid step.
# ----------------------------------------------------------------------------
def _channel_attention_kernel(x_ref, w1t_ref, w2t_ref, o_ref, *, inv_hw):
    """x block (Bb, C, HW); w1t (C, Ch); w2t (Ch, C); out (Bb, C, HW)."""
    x = x_ref[...]                                             # (Bb, C, HW)
    bb = x.shape[0]

    # Spatial (lane-axis) reductions.  The block's last dim is the full HW, so
    # Mosaic masks the partial tail vreg itself when HW % 128 != 0 -- no
    # explicit padding or -inf masking needed.  Sum accumulates in f32 so a
    # bf16 x still matches the reference.
    avg = jnp.sum(x, axis=2, dtype=jnp.float32) * inv_hw       # (Bb, C)
    mx = jnp.max(x, axis=2).astype(jnp.float32)                # (Bb, C)

    # Fused avg/max branches through the shared 1x1-conv MLP: one matmul pair
    # instead of four.
    pooled = jnp.concatenate([avg, mx], axis=0)                # (2*Bb, C)
    h = jnp.maximum(
        jnp.dot(pooled, w1t_ref[...], preferred_element_type=jnp.float32), 0.0)
    out = jnp.dot(h, w2t_ref[...], preferred_element_type=jnp.float32)
    scale = jax.nn.sigmoid(out[:bb] + out[bb:])                # (Bb, C) f32

    # Re-read x from the ref for the store: keeps the block-sized value's live
    # range out of the MLP section (less VMEM pressure / spill risk).
    o_ref[...] = (x_ref[...].astype(jnp.float32)
                  * scale[:, :, None]).astype(o_ref.dtype)


# ----------------------------------------------------------------------------
# Fallback path (slab > block cap): HW-tiled reduce-then-apply.
# ----------------------------------------------------------------------------
def _pool_mlp_kernel(x_ref, w1t_ref, w2t_ref, scale_ref, sum_sc, max_sc,
                     *, hw, hw_tile):
    """Accumulate per-channel sum/max over HW tiles; finalize -> sigmoid scale.

    x block (1, C, hw_tile); scale out block (1, C, 1); scratch (1, C) f32 x2.
    """
    j = pl.program_id(1)

    @pl.when(j == 0)
    def _():
        sum_sc[...] = jnp.zeros_like(sum_sc)
        max_sc[...] = jnp.full_like(max_sc, -jnp.inf)

    x = x_ref[...]                                             # (1, C, hw_tile)
    if hw % hw_tile != 0:
        # Only the last tile overhangs HW; mask its out-of-bounds lanes.
        lane = jax.lax.broadcasted_iota(jnp.int32, x.shape, 2)
        valid = lane < (hw - j * hw_tile)
        x_sum = jnp.where(valid, x, 0)
        x_max = jnp.where(valid, x, -jnp.inf)
    else:
        x_sum = x
        x_max = x
    sum_sc[...] += jnp.sum(x_sum, axis=2, dtype=jnp.float32)
    max_sc[...] = jnp.maximum(max_sc[...],
                              jnp.max(x_max, axis=2).astype(jnp.float32))

    @pl.when(j == pl.num_programs(1) - 1)
    def _():
        avg = sum_sc[...] * (1.0 / hw)                         # (1, C)
        pooled = jnp.concatenate([avg, max_sc[...]], axis=0)   # (2, C)
        h = jnp.maximum(
            jnp.dot(pooled, w1t_ref[...],
                    preferred_element_type=jnp.float32), 0.0)
        out = jnp.dot(h, w2t_ref[...], preferred_element_type=jnp.float32)
        scale = jax.nn.sigmoid(out[:1] + out[1:])              # (1, C)
        scale_ref[...] = scale[:, :, None].astype(scale_ref.dtype)


def _apply_scale_kernel(x_ref, scale_ref, o_ref):
    """x block (1, C, hw_tile) * per-channel scale (1, C, 1) -> out."""
    s = scale_ref[...].astype(jnp.float32)
    o_ref[...] = (x_ref[...].astype(jnp.float32) * s).astype(o_ref.dtype)


# ----------------------------------------------------------------------------
# Wrapper
# ----------------------------------------------------------------------------
@functools.partial(jax.jit, donate_argnums=(0,),
                   static_argnames=("block_bytes_cap",))
def channel_attention(x, w1, w2, *, block_bytes_cap=None):
    """x: (B, C, H, W) (donated); w1: (C//16, C); w2: (C, C//16).

    Callers may pass bf16 x/weights to halve HBM traffic; reductions and the
    final multiply run in f32 inside the kernel.
    """
    B, C, H, W = x.shape
    Ch = w1.shape[0]
    HW = H * W
    itemsize = jnp.dtype(x.dtype).itemsize

    cap = _block_bytes_cap() if block_bytes_cap is None else int(block_bytes_cap)
    per_batch_bytes = C * HW * itemsize
    w_bytes = (w1.size + w2.size) * jnp.dtype(w1.dtype).itemsize

    x_flat = x.reshape(B, C, HW)        # free reshape; no pad, no slice
    w1t = w1.T                          # (C, Ch)
    w2t = w2.T                          # (Ch, C)

    # TODO(synk): confirm "parallel" actually shards the batch grid axis across
    # both v7x TensorCores; if not, switch that axis to pltpu.CORE_PARALLEL.

    if per_batch_bytes <= cap:
        # -- single-pass path: one read + one (aliased) write of x -----------
        Bb = _pick_batch_block(B, per_batch_bytes, cap)
        block_bytes = Bb * per_batch_bytes
        # 2x double-buffered in + 2x out + ~2x headroom for in-kernel f32
        # temporaries (cast block, broadcast scale), plus the tiny weights.
        vmem_limit = int(max(6 * block_bytes + 4 * w_bytes + (4 << 20),
                             16 << 20))

        kernel = functools.partial(_channel_attention_kernel, inv_hw=1.0 / HW)
        out_flat = pl.pallas_call(
            kernel,
            out_shape=jax.ShapeDtypeStruct((B, C, HW), x.dtype),
            grid_spec=pltpu.PrefetchScalarGridSpec(
                num_scalar_prefetch=0,
                grid=(B // Bb,),
                in_specs=[
                    pl.BlockSpec((Bb, C, HW), lambda b: (b, 0, 0)),
                    pl.BlockSpec((C, Ch), lambda b: (0, 0)),   # w1.T (resident)
                    pl.BlockSpec((Ch, C), lambda b: (0, 0)),   # w2.T (resident)
                ],
                out_specs=pl.BlockSpec((Bb, C, HW), lambda b: (b, 0, 0)),
            ),
            input_output_aliases={0: 0},    # reuse x's HBM buffer for output
            compiler_params=pltpu.CompilerParams(
                dimension_semantics=("parallel",),
                vmem_limit_bytes=vmem_limit,
            ),
        )(x_flat, w1t, w2t)
        return out_flat.reshape(B, C, H, W)

    # -- fallback: a single (1, C, HW) slab exceeds the block cap ------------
    # Two passes over x: HW-tiled reduce (MLP fused into the finalize step),
    # then an HW-tiled apply with the output aliased onto x.
    hw_tile = max(_LANE, (cap // max(C * itemsize, 1)) // _LANE * _LANE)
    hw_tile = min(hw_tile, HW)
    n_hw = pl.cdiv(HW, hw_tile)
    tile_bytes = C * hw_tile * itemsize
    vmem_limit = int(max(6 * tile_bytes + 4 * w_bytes + (4 << 20), 16 << 20))
    # TODO(synk): also tile the channel axis if C*128*itemsize alone exceeds
    # the block cap (extreme-C case); not needed for typical CBAM shapes.

    reduce_kernel = functools.partial(_pool_mlp_kernel, hw=HW, hw_tile=hw_tile)
    scale = pl.pallas_call(
        reduce_kernel,
        out_shape=jax.ShapeDtypeStruct((B, C, 1), jnp.float32),
        grid_spec=pltpu.PrefetchScalarGridSpec(
            num_scalar_prefetch=0,
            grid=(B, n_hw),
            in_specs=[
                pl.BlockSpec((1, C, hw_tile), lambda b, j: (b, 0, j)),
                pl.BlockSpec((C, Ch), lambda b, j: (0, 0)),
                pl.BlockSpec((Ch, C), lambda b, j: (0, 0)),
            ],
            out_specs=pl.BlockSpec((1, C, 1), lambda b, j: (b, 0, 0)),
            scratch_shapes=[pltpu.VMEM((1, C), jnp.float32),   # running sum
                            pltpu.VMEM((1, C), jnp.float32)],  # running max
        ),
        compiler_params=pltpu.CompilerParams(
            dimension_semantics=("parallel", "arbitrary"),
            vmem_limit_bytes=vmem_limit,
        ),
    )(x_flat, w1t, w2t)

    out_flat = pl.pallas_call(
        _apply_scale_kernel,
        out_shape=jax.ShapeDtypeStruct((B, C, HW), x.dtype),
        grid_spec=pltpu.PrefetchScalarGridSpec(
            num_scalar_prefetch=0,
            grid=(B, n_hw),
            in_specs=[
                pl.BlockSpec((1, C, hw_tile), lambda b, j: (b, 0, j)),
                pl.BlockSpec((1, C, 1), lambda b, j: (b, 0, 0)),
            ],
            out_specs=pl.BlockSpec((1, C, hw_tile), lambda b, j: (b, 0, j)),
        ),
        input_output_aliases={0: 0},
        compiler_params=pltpu.CompilerParams(
            dimension_semantics=("parallel", "arbitrary"),
            vmem_limit_bytes=vmem_limit,
        ),
    )(x_flat, scale)
    return out_flat.reshape(B, C, H, W)


# ----------------------------------------------------------------------------
# Reference + self-test
# ----------------------------------------------------------------------------
def _reference(x, w1, w2):
    # Pure-JAX mirror of the PyTorch forward.
    avg = jnp.mean(x, axis=(2, 3))                     # (B, C)
    mx = jnp.max(x, axis=(2, 3))                       # (B, C)

    def mlp(p):
        return jnp.maximum(p @ w1.T, 0.0) @ w2.T

    out = jax.nn.sigmoid(mlp(avg) + mlp(mx))           # (B, C)
    return x * out[:, :, None, None]


def _make_inputs(key, B, C, H, W):
    kx, k1, k2 = jax.random.split(key, 3)
    Ch = C // 16
    x = jax.random.normal(kx, (B, C, H, W), dtype=jnp.float32)
    # PyTorch conv weights (Ch,C,1,1)/(C,Ch,1,1) squeezed to 2-D.
    w1 = jax.random.normal(k1, (Ch, C), dtype=jnp.float32) * 0.1
    w2 = jax.random.normal(k2, (C, Ch), dtype=jnp.float32) * 0.1
    return x, w1, w2


if __name__ == "__main__":
    root = jax.random.PRNGKey(0)
    k_a, k_b, k_c = jax.random.split(root, 3)

    # 1) Single-pass path, 128-aligned spatial; B=2 -> 2 grid steps (both TCs).
    #    (x is donated, so compute the reference first.)
    x, w1, w2 = _make_inputs(k_a, 2, 64, 16, 16)
    ref = jax.block_until_ready(_reference(x, w1, w2))
    out = jax.block_until_ready(channel_attention(x, w1, w2))
    assert jnp.allclose(out, ref, atol=1e-5, rtol=1e-5), "single-pass mismatch"

    # 2) Single-pass path, unaligned spatial (HW=144): Mosaic masks the tail
    #    vreg of the lane reduction / store; no wrapper pad/slice.
    x, w1, w2 = _make_inputs(k_b, 4, 32, 12, 12)
    ref = jax.block_until_ready(_reference(x, w1, w2))
    out = jax.block_until_ready(channel_attention(x, w1, w2))
    assert jnp.allclose(out, ref, atol=1e-5, rtol=1e-5), "unaligned-HW mismatch"

    # 3) HW-tiled reduce-then-apply fallback, forced via a tiny block cap
    #    (also exercises the partial last HW tile's mask).
    x, w1, w2 = _make_inputs(k_c, 2, 64, 12, 12)
    ref = jax.block_until_ready(_reference(x, w1, w2))
    out = jax.block_until_ready(
        channel_attention(x, w1, w2, block_bytes_cap=32 * 1024))
    assert jnp.allclose(out, ref, atol=1e-5, rtol=1e-5), "fallback mismatch"

    print("KERNEL_OK")
</pallas_src>

<mosaic_0001>
module attributes {stable_mosaic.version = 11 : i64} {
  func.func @_channel_attention_kernel(%arg0: i32, %arg1: memref<1x64x256xf32, #tpu.memory_space<vmem>>, %arg2: memref<64x4xf32, #tpu.memory_space<vmem>>, %arg3: memref<4x64xf32, #tpu.memory_space<vmem>>, %arg4: memref<1x64x256xf32, #tpu.memory_space<vmem>>) attributes {dimension_semantics = [#tpu.dimension_semantics<parallel>], iteration_bounds = array<i64: 2>, scalar_prefetch = 0 : i64, scratch_operands = 0 : i64, tpu.core_type = #tpu.core_type<tc>, window_params = [{transform_indices = @transform_0, window_bounds = array<i64: 1, 64, 256>}, {pipeline_mode = #tpu.pipeline_mode<synchronous>, transform_indices = @transform_1, window_bounds = array<i64: 64, 4>}, {pipeline_mode = #tpu.pipeline_mode<synchronous>, transform_indices = @transform_2, window_bounds = array<i64: 4, 64>}, {transform_indices = @transform_3, window_bounds = array<i64: 1, 64, 256>}]} {
    %c0 = arith.constant 0 : index
    %c0_0 = arith.constant 0 : index
    %c0_1 = arith.constant 0 : index
    %0 = vector.load %arg1[%c0, %c0_0, %c0_1] : memref<1x64x256xf32, #tpu.memory_space<vmem>>, vector<1x64x256xf32>
    %cst = arith.constant dense<0.000000e+00> : vector<1x64xf32>
    %1 = vector.multi_reduction <add>, %0, %cst [2] : vector<1x64x256xf32> to vector<1x64xf32>
    %cst_2 = arith.constant 3.906250e-03 : f32
    %2 = vector.broadcast %cst_2 : f32 to vector<1x64xf32>
    %3 = arith.mulf %1, %2 : vector<1x64xf32>
    %cst_3 = arith.constant dense<0xFF800000> : vector<1x64xf32>
    %4 = vector.multi_reduction <maximumf>, %0, %cst_3 [2] : vector<1x64x256xf32> to vector<1x64xf32>
    %5 = tpu.concatenate %3, %4 in 0 : vector<1x64xf32>, vector<1x64xf32> -> vector<2x64xf32>
    %c0_4 = arith.constant 0 : index
    %c0_5 = arith.constant 0 : index
    %6 = vector.load %arg2[%c0_4, %c0_5] : memref<64x4xf32, #tpu.memory_space<vmem>>, vector<64x4xf32>
    %cst_6 = arith.constant dense<0.000000e+00> : vector<2x4xf32>
    %7 = tpu.matmul %5, %6, %cst_6 {dimension_numbers = #tpu.dot_dimension_numbers<[1], [0], [0], [1], [0, 0, 1, 1], [], []>} : vector<2x64xf32>, vector<64x4xf32>, vector<2x4xf32> -> vector<2x4xf32>
    %cst_7 = arith.constant 0.000000e+00 : f32
    %8 = vector.broadcast %cst_7 : f32 to vector<2x4xf32>
    %9 = arith.maximumf %7, %8 : vector<2x4xf32>
    %c0_8 = arith.constant 0 : index
    %c0_9 = arith.constant 0 : index
    %10 = vector.load %arg3[%c0_8, %c0_9] : memref<4x64xf32, #tpu.memory_space<vmem>>, vector<4x64xf32>
    %cst_10 = arith.constant dense<0.000000e+00> : vector<2x64xf32>
    %11 = tpu.matmul %9, %10, %cst_10 {dimension_numbers = #tpu.dot_dimension_numbers<[1], [0], [0], [1], [0, 0, 1, 1], [], []>} : vector<2x4xf32>, vector<4x64xf32>, vector<2x64xf32> -> vector<2x64xf32>
    %12 = vector.extract_strided_slice %11 {offsets = [0, 0], sizes = [1, 64], strides = [1, 1]} : vector<2x64xf32> to vector<1x64xf32>
    %13 = vector.extract_strided_slice %11 {offsets = [1, 0], sizes = [1, 64], strides = [1, 1]} : vector<2x64xf32> to vector<1x64xf32>
    %14 = arith.addf %12, %13 : vector<1x64xf32>
    %15 = arith.negf %14 : vector<1x64xf32>
    %16 = math.exp %15 : vector<1x64xf32>
    %cst_11 = arith.constant 1.000000e+00 : f32
    %17 = vector.broadcast %cst_11 : f32 to vector<1x64xf32>
    %18 = arith.addf %17, %16 : vector<1x64xf32>
    %19 = arith.divf %17, %18 : vector<1x64xf32>
    %c0_12 = arith.constant 0 : index
    %c0_13 = arith.constant 0 : index
    %c0_14 = arith.constant 0 : index
    %20 = vector.load %arg1[%c0_12, %c0_13, %c0_14] : memref<1x64x256xf32, #tpu.memory_space<vmem>>, vector<1x64x256xf32>
    %21 = vector.shape_cast %19 : vector<1x64xf32> to vector<1x64x1xf32>
    %22 = vector.broadcast %21 : vector<1x64x1xf32> to vector<1x64x256xf32>
    %23 = arith.mulf %20, %22 : vector<1x64x256xf32>
    %c0_15 = arith.constant 0 : index
    %c0_16 = arith.constant 0 : index
    %c0_17 = arith.constant 0 : index
    %24 = vector.load %arg4[%c0_15, %c0_16, %c0_17] : memref<1x64x256xf32, #tpu.memory_space<vmem>>, vector<1x64x256xf32>
    tpu.vector_store %arg4[%c0_15, %c0_16, %c0_17], %23 {strides = array<i32>} : memref<1x64x256xf32, #tpu.memory_space<vmem>>, vector<1x64x256xf32>,
    return
  }
  func.func @transform_0(%arg0: i32) -> (i32, i32, i32) {
    %c0_i32 = arith.constant 0 : i32
    %c0_i32_0 = arith.constant 0 : i32
    %c0_i32_1 = arith.constant 0 : i32
    return %arg0, %c0_i32, %c0_i32_0 : i32, i32, i32
  }
  func.func @transform_1(%arg0: i32) -> (i32, i32) {
    %c0_i32 = arith.constant 0 : i32
    %c0_i32_0 = arith.constant 0 : i32
    %c0_i32_1 = arith.constant 0 : i32
    return %c0_i32, %c0_i32_0 : i32, i32
  }
  func.func @transform_2(%arg0: i32) -> (i32, i32) {
    %c0_i32 = arith.constant 0 : i32
    %c0_i32_0 = arith.constant 0 : i32
    %c0_i32_1 = arith.constant 0 : i32
    return %c0_i32, %c0_i32_0 : i32, i32
  }
  func.func @transform_3(%arg0: i32) -> (i32, i32, i32) {
    %c0_i32 = arith.constant 0 : i32
    %c0_i32_0 = arith.constant 0 : i32
    %c0_i32_1 = arith.constant 0 : i32
    return %arg0, %c0_i32, %c0_i32_0 : i32, i32, i32
  }
}

</mosaic_0001>

<bundles_post_ra>
// kernel: channel_attention.1
= control target key start
LH: loop header
LB: loop body
LE: loop exit
PB: predicated region body
PF: predicated region fallthrough
CT: control target
= control target key end

     0   :  { %s761_s12 = smov 0   ;;  %s947_s0 = inlined_call_operand.vmem [shape: f32[2,64,256], index: 0, kind: input, shape index: {}, may-alias: {0,3}]   ;;  %s948_s1 = inlined_call_operand.vmem [shape: f32[64,4], index: 1, kind: input, shape index: {}]   ;;  %s949_s2 = inlined_call_operand.vmem [shape: f32[4,64], index: 2, kind: input, shape index: {}]   ;;  %s950_s3 = inlined_call_operand.vmem [shape: f32[2,64,256], index: 3, kind: output, shape index: {}, may-alias: {0,3}]  }
   0x1 LB: > { %s651_s13 = sadd.s32 4294967295, %s736_s12   ;;  %p655_p0 = scmp.ge.s32.totalorder %s736_s12, 1  ;;  %s736_s12 = sphi %s761_s12, %s13_s12  }
   0x2   : > { %p137_p1 = scmp.lt.s32.totalorder %s736_s12, 3 }
   0x4   : > { %p138_p2 = pnand %p655_p0, %p137_p1 }
   0x5   : > { %p161_p3 = scmp.lt.s32.totalorder (!%p138_p2), %s651_s13, 1  ;;  %v357_v32 = vld [vmem:[%s948_s1] sm:$0xff] (!%p138_p2)  ;;  %v358_v33 = vld [vmem:[%s948_s1 + $0x8] sm:$0xff] (!%p138_p2)  ;;  %v738_v35 = vmov (!%p138_p2), 0.0|0.0   ;;  %v359_v36 = vld [vmem:[%s948_s1 + $0x10] sm:$0xff] (!%p138_p2)  ;;  %vm739_vm0 = vmmov (!%p138_p2), 0   ;;  %v251_v49 = vlaneseq (!%p138_p2) }
   0x6   : > { %141 = sbr.rel (%p138_p2) target bundleno = 787 (0x313), region = 32  ;;  %v704_v34 = vpack.c.bf16 (!%p138_p2), %v358_v33, %v357_v32  ;;  %703 = vmatprep.subr.bf16.mxu0 (!%p138_p2), %v738_v35  ;;  %v360_v37 = vld [vmem:[%s948_s1 + $0x18] sm:$0xff] (!%p138_p2)  ;;  %v361_v39 = vld [vmem:[%s948_s1 + $0x20] sm:$0xff] (!%p138_p2)  ;;  %v362_v40 = vld [vmem:[%s948_s1 + $0x28] sm:$0xff] (!%p138_p2)  ;;  %v740_v45 = vmov (!%p138_p2), 0.0   ;;  %vm262_vm1 = vcmask (!%p138_p2), 130112  }
   0x7   : > { %v707_v38 = vpack.c.bf16 (!%p138_p2), %v360_v37, %v359_v36  ;;  %v710_v41 = vpack.c.bf16 (!%p138_p2), %v362_v40, %v361_v39  ;;  %v363_v42 = vld [vmem:[%s948_s1 + $0x30] sm:$0xff] (!%p138_p2)  ;;  %v364_v43 = vld [vmem:[%s948_s1 + $0x38] sm:$0xff] (!%p138_p2)  ;;  %695 = vmatprep.mubr.msk.f32.mxu0 (!%p138_p2), %vm739_vm0, %v740_v45  ;;  %698 = vmatprep.subr.mxu1 (!%p138_p2), %v740_v45  ;;  %v252_v52 = vand.u32 (!%p138_p2), 127, %v251_v49  ;;  %v883_v56 = vshrl.u32 (!%p138_p2), %v251_v49, 7 }
   0x8   : > { %705 = vmatpush3.bf16.msra.mxu0 (!%p138_p2), %v704_v34  ;;  %v713_v44 = vpack.c.bf16 (!%p138_p2), %v364_v43, %v363_v42  ;;  %700 = vmatprep.mubr.msk.f32.mxu1 (!%p138_p2), %vm739_vm0, %v740_v45  ;;  %vm269_vm2 = vcmask (!%p138_p2), 195712   ;;  %vm276_vm3 = vcmask (!%p138_p2), 261312   ;;  %vm283_vm4 = vcmask (!%p138_p2), 326912  }
   0x9   : > { %706 = vmatprep.subr.bf16.mxu0 (!%p138_p2), %v738_v35  ;;  %v257_v54 = vadd.s32 (!%p138_p2), 4294967288, %v252_v52  ;;  %v264_v60 = vadd.s32 (!%p138_p2), 4294967280, %v252_v52  ;;  %v255_v62 = vsub.s32 (!%p138_p2), %v252_v52, %v883_v56  ;;  %vm290_vm5 = vcmask (!%p138_p2), 392512  }
   0xa   : > { %vm297_vm6 = vcmask (!%p138_p2), 458112   ;;  %vm304_vm7 = vcmask (!%p138_p2), 523712   ;;  %vm355_vm8 = vcmask (!%p138_p2), 1040384   ;;  %vm365_vm9 = vcmask (!%p138_p2), 523264  }
   0xb   : > { %v260_v58 = vsub.s32 (!%p138_p2), %v257_v54, %v883_v56  ;;  %vm445_vm10 = vcmask (!%p138_p2), 1043456   ;;  %vm441_vm11 = vcmask (!%p138_p2), 31744  }
   0xc   : > { %708 = vmatpush3.bf16.msra.mxu0 (!%p138_p2), %v707_v38 }
   0xd   : > { %s952_s13 = smov (!%p161_p3, %s651_s13), 1  ;;  %709 = vmatprep.subr.bf16.mxu0 %v738_v35 }
   0xe   : > { %s666_s14 = sshll.u32 %s952_s13, 7 }
   0xf   : > { %s777_s17 = scalar_lea.vmem %s947_s0, %s666_s14  ;;  %s910_s11 = scalar_lea.vmem %s950_s3, %s666_s14 }
  0x10   : > { %v780_v0 = vld [vmem:[%s777_s17 + $0x20] sm:$0xff]  ;;  %v783_v1 = vld [vmem:[%s777_s17 + $0x28] sm:$0xff]  ;;  %v794_v5 = vld [vmem:[%s777_s17 + $0x30] sm:$0xff]  ;;  %711 = vmatpush3.bf16.msra.mxu0 %v710_v41 }
  0x11   : > { %v786_v2 = vld [vmem:[%s777_s17] sm:$0xff]  ;;  %v193_v3 = vadd.f32 %v783_v1, %v780_v0  ;;  %v791_v4 = vld [vmem:[%s777_s17 + $0x8] sm:$0xff]  ;;  %v797_v6 = vld [vmem:[%s777_s17 + $0x38] sm:$0xff]  ;;  %v225_v16 = vmax.f32 %v780_v0, %v783_v1  ;;  %712 = vmatprep.subr.bf16.mxu0 %v738_v35 }
  0x12   : > { %v187_v7 = vadd.f32 %v791_v4, %v786_v2  ;;  %v802_v8 = vld [vmem:[%s777_s17 + $0x10] sm:$0xff]  ;;  %v805_v9 = vld [vmem:[%s777_s17 + $0x18] sm:$0xff]  ;;  %v196_v10 = vadd.f32 %v797_v6, %v794_v5  ;;  %v219_v13 = vmax.f32 %v786_v2, %v791_v4  ;;  %v816_v14 = vld [vmem:[%s777_s17 + $0x40] sm:$0xff]  ;;  %v228_v20 = vmax.f32 %v794_v5, %v797_v6 }
  0x13   : > { %194 = vadd.xlane.f32.xlu1 %v193_v3  ;;  %v190_v11 = vadd.f32 %v805_v9, %v802_v8  ;;  %v222_v12 = vmax.f32 %v802_v8, %v805_v9  ;;  %v819_v15 = vld [vmem:[%s777_s17 + $0x48] sm:$0xff]  ;;  %v826_v18 = vld [vmem:[%s777_s17 + $0x50] sm:$0xff]  ;;  %v829_v19 = vld [vmem:[%s777_s17 + $0x58] sm:$0xff]  ;;  %v271_v3 = vadd.s32 4294967272, %v252_v52 }
  0x14   : > { %188 = vadd.xlane.f32.xlu0 %v187_v7  ;;  %v199_v17 = vadd.f32 %v819_v15, %v816_v14  ;;  %v202_v21 = vadd.f32 %v829_v19, %v826_v18  ;;  %v836_v22 = vld [vmem:[%s777_s17 + $0x60] sm:$0xff]  ;;  %v839_v23 = vld [vmem:[%s777_s17 + $0x68] sm:$0xff]  ;;  %v231_v24 = vmax.f32 %v816_v14, %v819_v15  ;;  %v846_v26 = vld [vmem:[%s777_s17 + $0x70] sm:$0xff]  ;;  %v234_v28 = vmax.f32 %v826_v18, %v829_v19 }
  0x15   : > { %v205_v25 = vadd.f32 %v839_v23, %v836_v22  ;;  %v849_v27 = vld [vmem:[%s777_s17 + $0x78] sm:$0xff]  ;;  %v237_v31 = vmax.f32 %v836_v22, %v839_v23  ;;  %714 = vmatpush3.bf16.msra.mxu0 %v713_v44 }
  0x16   : > { %v208_v29 = vadd.f32 %v849_v27, %v846_v26  ;;  %v240_v30 = vmax.f32 %v846_v26, %v849_v27 }
  0x17   : > { %197 = vadd.xlane.f32.xlu1 %v196_v10  ;;  %v278_v10 = vadd.s32 4294967264, %v252_v52 }
  0x18   : > { %191 = vadd.xlane.f32.xlu0 %v190_v11  ;;  %v285_v11 = vadd.s32 4294967256, %v252_v52 }
  0x1a   : > { %v288_v32 = vsub.s32 %v285_v11, %v883_v56 }
  0x1b   : > { %223 = vmax.xlane.f32.xlu1 %v222_v12 }
  0x1c   : > { %220 = vmax.xlane.f32.xlu0 %v219_v13  ;;  %v267_v13 = vsub.s32 %v264_v60, %v883_v56 }
  0x1f   : > { %226 = vmax.xlane.f32.xlu1 %v225_v16 }
  0x20   : > { %200 = vadd.xlane.f32.xlu0 %v199_v17 }
  0x23   : > { %229 = vmax.xlane.f32.xlu1 %v228_v20  ;;  %v292_v20 = vadd.s32 4294967248, %v252_v52 }
  0x24   : > { %203 = vadd.xlane.f32.xlu0 %v202_v21 }
  0x25   : > { %v295_v39 = vsub.s32 %v292_v20, %v883_v56  ;;  %v440_v20 = vld [vmem:[%s949_s2] sm:$0xf] }
  0x26   : > { %699 = vmatpush3.msk.msra.mxu1 %vm445_vm10, %v440_v20 }
  0x27   : > { %232 = vmax.xlane.f32.xlu1 %v231_v24  ;;  %v274_v24 = vsub.s32 %v271_v3, %v883_v56 }
  0x28   : > { %206 = vadd.xlane.f32.xlu0 %v205_v25 }
  0x2b   : > { %235 = vmax.xlane.f32.xlu1 %v234_v28 }
  0x2c   : > { %209 = vadd.xlane.f32.xlu0 %v208_v29  ;;  %v299_v29 = vadd.s32 4294967240, %v252_v52 }
  0x2e   : > { %v302_v44 = vsub.s32 %v299_v29, %v883_v56 }
  0x2f   : > { %241 = vmax.xlane.f32.xlu1 %v240_v30  ;;  %v281_v30 = vsub.s32 %v278_v10, %v883_v56 }
  0x30   : > { %238 = vmax.xlane.f32.xlu0 %v237_v31 }
  0xa0   : > { %v195_v46 = vpop.xlane.xlu1 %194 }
  0xa1   : > { %v189_v47 = vpop.xlane.xlu0 %188  ;;  %v213_v16 = vmul.f32 0.00390625, %v195_v46 }
  0xa2   : > { %v211_v63 = vmul.f32 0.00390625, %v189_v47 }
  0xa3   : > { %v268_v37 = vrot.slane %v213_v16, %v267_v13 }
  0xa4   : > { %v198_v48 = vpop.xlane.xlu1 %197  ;;  %v256_v21 = vrot.slane %v211_v63, %v255_v62 }
  0xa5   : > { %v192_v50 = vpop.xlane.xlu0 %191  ;;  %v214_v25 = vmul.f32 0.00390625, %v198_v48 }
  0xa6   : > { %v212_v59 = vmul.f32 0.00390625, %v192_v50 }
  0xa7   : > { %v275_v42 = vrot.slane %v214_v25, %v274_v24 }
  0xa8   : > { %v224_v51 = vpop.xlane.xlu1 %223  ;;  %v261_v12 = vrot.slane %v212_v59, %v260_v58 }
  0xa9   : > { %v221_v53 = vpop.xlane.xlu0 %220  ;;  %v322_v34 = vrot.slane %v224_v51, %v260_v58 }
  0xaa   : > { %v263_v33 = vsel %vm262_vm1, %v261_v12, %v256_v21  ;;  %v318_v35 = vrot.slane %v221_v53, %v255_v62 }
  0xab   : > { %v270_v46 = vsel %vm269_vm2, %v268_v37, %v263_v33 }
  0xac   : > { %v227_v55 = vpop.xlane.xlu1 %226  ;;  %v323_v50 = vsel %vm262_vm1, %v322_v34, %v318_v35  ;;  %v531_v35 = vsub.s32 0, %v883_v56 }
  0xad   : > { %v201_v57 = vpop.xlane.xlu0 %200  ;;  %v327_v38 = vrot.slane %v227_v55, %v267_v13 }
  0xae   : > { %v215_v31 = vmul.f32 0.00390625, %v201_v57  ;;  %v277_v57 = vsel %vm276_vm3, %v275_v42, %v270_v46 }
  0xaf   : > { %v328_v53 = vsel %vm269_vm2, %v327_v38, %v323_v50 }
  0xb0   : > { %v230_v61 = vpop.xlane.xlu1 %229  ;;  %v282_v47 = vrot.slane %v215_v31, %v281_v30 }
  0xb1   : > { %v204_v7 = vpop.xlane.xlu0 %203  ;;  %v332_v43 = vrot.slane %v230_v61, %v274_v24 }
  0xb2   : > { %v216_v36 = vmul.f32 0.00390625, %v204_v7  ;;  %v284_v62 = vsel %vm283_vm4, %v282_v47, %v277_v57 }
  0xb3   : > { %v333_v58 = vsel %vm276_vm3, %v332_v43, %v328_v53 }
  0xb4   : > { %v233_v17 = vpop.xlane.xlu1 %232  ;;  %v289_v51 = vrot.slane %v216_v36, %v288_v32 }
  0xb5   : > { %v207_v28 = vpop.xlane.xlu0 %206  ;;  %v337_v48 = vrot.slane %v233_v17, %v281_v30 }
  0xb6   : > { %v217_v40 = vmul.f32 0.00390625, %v207_v28  ;;  %v291_v7 = vsel %vm290_vm5, %v289_v51, %v284_v62 }
  0xb7   : > { %v338_v63 = vsel %vm283_vm4, %v337_v48, %v333_v58 }
  0xb8   : > { %v236_v41 = vpop.xlane.xlu1 %235  ;;  %v296_v54 = vrot.slane %v217_v40, %v295_v39 }
  0xb9   : > { %v210_v45 = vpop.xlane.xlu0 %209  ;;  %v342_v52 = vrot.slane %v236_v41, %v288_v32 }
  0xba   : > { %v218_v49 = vmul.f32 0.00390625, %v210_v45  ;;  %v298_v11 = vsel %vm297_vm6, %v296_v54, %v291_v7 }
  0xbb   : > { %v343_v10 = vsel %vm290_vm5, %v342_v52, %v338_v63 }
  0xbc   : > { %v242_v55 = vpop.xlane.xlu1 %241  ;;  %v303_v59 = vrot.slane %v218_v49, %v302_v44 }
  0xbd   : > { %v239_v60 = vpop.xlane.xlu0 %238  ;;  %v352_v61 = vrot.slane %v242_v55, %v302_v44 }
  0xbe   : > { %v347_v3 = vrot.slane %v239_v60, %v295_v39  ;;  %v305_v16 = vsel %vm304_vm7, %v303_v59, %v298_v11 }
  0xc0   : > { %v348_v12 = vsel %vm297_vm6, %v347_v3, %v343_v10 }
  0xc1   : > { %v353_v13 = vsel %vm304_vm7, %v352_v61, %v348_v12 }
  0xc2   : > { %v356_v17 = vsel %vm355_vm8, %v305_v16, %v353_v13 }
  0xc3   : > { %696 = vmatmul.mubr.msk.f32.vlgmr.msra.gmra.mrb[0].mxu0 %vm365_vm9, %v356_v17 }
 0x196   : > { %v435_v21 = vpop.f32.mrb[0].mxu0 }
 0x197   : > { %v439_v24 = vmax.f32 %v435_v21, 0.0  ;;  %v697_v25 = vpop.f32.mrb[1].mxu0 }
 0x199   : > { %701 = vmatmul.mubr.msk.f32.vlgmr.msra.gmra.mrb[0].mxu1 %vm441_vm11, %v439_v24 }
 0x26c   : > { %v515_v28 = vpop.f32.mrb[0].mxu1 }
 0x26d   : > { %v520_v29 = vrot.slane %v515_v28, 1  ;;  %v702_v30 = vpop.f32.mrb[1].mxu1 }
 0x26f   : > { %v522_v31 = vadd.f32 %v520_v29, %v515_v28 }
 0x271   : > { %v663_v32 = vmul.f32 -1.442695, %v522_v31 }
 0x273   : > { %726 = vpow2.f32 %v663_v32 }
 0x27d   : > { %v727_v33 = vpop.eup %726 }
 0x27e   : > { %v526_v34 = vadd.f32 1.0, %v727_v33 }
 0x280   : > { %728 = vrcp.f32 %v526_v34 }
 0x28a   : > { %v729_v36 = vpop.eup %728 }
 0x28b   : > { %v532_v37 = vrot.slane %v729_v36, %v531_v35 }
 0x28d   : > { %538 = vbcast.lane.b32.xlu1 %v532_v37, 264  ;;  %534 = vbcast.lane.b32.xlu0 %v532_v37, 256 }
 0x291   : > { %542 = vbcast.lane.b32.xlu1 %v532_v37, 272  ;;  %550 = vbcast.lane.b32.xlu0 %v532_v37, 288 }
 0x295   : > { %546 = vbcast.lane.b32.xlu1 %v532_v37, 280  ;;  %558 = vbcast.lane.b32.xlu0 %v532_v37, 304 }
 0x299   : > { %554 = vbcast.lane.b32.xlu1 %v532_v37, 296 }
 0x29d   : > { %562 = vbcast.lane.b32.xlu1 %v532_v37, 312 }
 0x2ff   : > { %v539_v56 = vpop.permute.xlu1 %538  ;;  %v535_v38 = vpop.permute.xlu0 %534 }
 0x300   : > { %v566_v39 = vmul.f32 %v539_v56, %v802_v8  ;;  %v567_v40 = vmul.f32 %v539_v56, %v805_v9  ;;  %v564_v41 = vmul.f32 %v535_v38, %v786_v2  ;;  %v565_v42 = vmul.f32 %v535_v38, %v791_v4 }
 0x302   : > { %582 = vst [vmem:[%s910_s11 + $0x10] sm:$0xff] %v566_v39  ;;  %583 = vst [vmem:[%s910_s11 + $0x18] sm:$0xff] %v567_v40 }
 0x303   : > { %580 = vst [vmem:[%s910_s11] sm:$0xff] %v564_v41  ;;  %581 = vst [vmem:[%s910_s11 + $0x8] sm:$0xff] %v565_v42  ;;  %v543_v43 = vpop.permute.xlu1 %542  ;;  %v551_v44 = vpop.permute.xlu0 %550 }
 0x304   : > { %v568_v45 = vmul.f32 %v543_v43, %v780_v0  ;;  %v569_v8 = vmul.f32 %v543_v43, %v783_v1  ;;  %v572_v9 = vmul.f32 %v551_v44, %v816_v14  ;;  %v573_v2 = vmul.f32 %v551_v44, %v819_v15 }
 0x306   : > { %584 = vst [vmem:[%s910_s11 + $0x20] sm:$0xff] %v568_v45  ;;  %585 = vst [vmem:[%s910_s11 + $0x28] sm:$0xff] %v569_v8 }
 0x307   : > { %588 = vst [vmem:[%s910_s11 + $0x40] sm:$0xff] %v572_v9  ;;  %589 = vst [vmem:[%s910_s11 + $0x48] sm:$0xff] %v573_v2  ;;  %v547_v4 = vpop.permute.xlu1 %546  ;;  %v559_v46 = vpop.permute.xlu0 %558 }
 0x308   : > { %v570_v47 = vmul.f32 %v547_v4, %v794_v5  ;;  %v571_v0 = vmul.f32 %v547_v4, %v797_v6  ;;  %v576_v1 = vmul.f32 %v559_v46, %v836_v22  ;;  %v577_v14 = vmul.f32 %v559_v46, %v839_v23 }
 0x30a   : > { %586 = vst [vmem:[%s910_s11 + $0x30] sm:$0xff] %v570_v47  ;;  %587 = vst [vmem:[%s910_s11 + $0x38] sm:$0xff] %v571_v0 }
 0x30b   : > { %592 = vst [vmem:[%s910_s11 + $0x60] sm:$0xff] %v576_v1  ;;  %593 = vst [vmem:[%s910_s11 + $0x68] sm:$0xff] %v577_v14  ;;  %v555_v15 = vpop.permute.xlu1 %554 }
 0x30c   : > { %v574_v48 = vmul.f32 %v555_v15, %v826_v18  ;;  %v575_v49 = vmul.f32 %v555_v15, %v829_v19 }
 0x30e   : > { %590 = vst [vmem:[%s910_s11 + $0x50] sm:$0xff] %v574_v48  ;;  %591 = vst [vmem:[%s910_s11 + $0x58] sm:$0xff] %v575_v49 }
 0x30f   : > { %v563_v5 = vpop.permute.xlu1 %562 }
 0x310   : > { %v578_v50 = vmul.f32 %v563_v5, %v846_v26  ;;  %v579_v6 = vmul.f32 %v563_v5, %v849_v27 }
 0x312   : > { %594 = vst [vmem:[%s910_s11 + $0x70] sm:$0xff] %v578_v50  ;;  %595 = vst [vmem:[%s910_s11 + $0x78] sm:$0xff] %v579_v6 }
 0x313 PF: > { %s13_s12 = sadd.s32 1, %s736_s12  }
 0x314   : > { %p10_p4 = scmp.ge.s32.totalorder %s13_s12, 4  }
 0x316   :  { %12 = sbr.rel (!%p10_p4) target bundleno = 1 (0x1), region = 62 }

</bundles_post_ra>
